<compile_context>
chip_gen: v7x
topology: tpu7x:2x2x1
jax: 0.10.0
libtpu: 0.0.40
codegen_flags: <defaults>
</compile_context>

<pallas_src>
import jax
import jax.numpy as jnp
import numpy as np
from jax.experimental import pallas as pl
from jax.experimental.pallas import tpu as pltpu


# ----------------------------------------------------------------------------
# Kernels
# ----------------------------------------------------------------------------
def _proj1_kernel(x_ref, w_ref, b_ref, o_ref):
    # x: (TM, D), w: (D, 8H), b: (1, 8H), o: (TM, 8H)  -- both directions fused.
    o_ref[...] = (
        jnp.dot(x_ref[...], w_ref[...], preferred_element_type=jnp.float32)
        + b_ref[...]
    ).astype(o_ref.dtype)


def _proj2_kernel(xa_ref, xb_ref, wa_ref, wb_ref, b_ref, o_ref):
    # Stacked-layer projection: consumes the previous layer's per-direction
    # outputs directly (avoids materializing concat([y_fwd, y_bwd]) in HBM).
    acc = jnp.dot(xa_ref[...], wa_ref[...], preferred_element_type=jnp.float32)
    acc = acc + jnp.dot(xb_ref[...], wb_ref[...], preferred_element_type=jnp.float32)
    o_ref[...] = (acc + b_ref[...]).astype(o_ref.dtype)


def _bilstm_scan_kernel(xp_f_ref, xp_b_ref, whh_f_ref, whh_b_ref,   # inputs
                        h0_ref, c0_ref,
                        yf_ref, yb_ref, hn_ref, cn_ref,             # outputs
                        hf_scr, cf_scr, hb_scr, cb_scr):            # VMEM scratch
    t = pl.program_id(0)
    H = whh_f_ref.shape[0]

    @pl.when(t == 0)
    def _():
        hf_scr[...] = h0_ref[0].astype(jnp.float32)
        cf_scr[...] = c0_ref[0].astype(jnp.float32)
        hb_scr[...] = h0_ref[1].astype(jnp.float32)
        cb_scr[...] = c0_ref[1].astype(jnp.float32)

    def cell(xp, h_prev, c_prev, whh):
        gates = xp + jnp.dot(h_prev, whh, preferred_element_type=jnp.float32)
        # PyTorch gate order: i, f, g, o (static lane slices of the 4H axis).
        i_g = jax.nn.sigmoid(gates[:, 0 * H:1 * H])
        f_g = jax.nn.sigmoid(gates[:, 1 * H:2 * H])
        g_g = jnp.tanh(gates[:, 2 * H:3 * H])
        o_g = jax.nn.sigmoid(gates[:, 3 * H:4 * H])
        c_new = f_g * c_prev + i_g * g_g
        h_new = o_g * jnp.tanh(c_new)
        return h_new, c_new

    hf, cf = cell(xp_f_ref[0].astype(jnp.float32), hf_scr[...], cf_scr[...],
                  whh_f_ref[...])
    hb, cb = cell(xp_b_ref[0].astype(jnp.float32), hb_scr[...], cb_scr[...],
                  whh_b_ref[...])

    hf_scr[...] = hf
    cf_scr[...] = cf
    hb_scr[...] = hb
    cb_scr[...] = cb
    yf_ref[0] = hf.astype(yf_ref.dtype)
    yb_ref[0] = hb.astype(yb_ref.dtype)

    @pl.when(t == pl.num_programs(0) - 1)
    def _():
        hn_ref[0] = hf.astype(hn_ref.dtype)
        hn_ref[1] = hb.astype(hn_ref.dtype)
        cn_ref[0] = cf.astype(cn_ref.dtype)
        cn_ref[1] = cb.astype(cn_ref.dtype)


# ----------------------------------------------------------------------------
# Wrappers
# ----------------------------------------------------------------------------
def _pick_row_tile(m: int) -> int:
    if m <= 1024:
        return m
    for t in (1024, 512, 256, 128, 64, 32, 16, 8):
        if m % t == 0:
            return t
    return m


def _fused_input_projection(x_sbd, w_cat, b_cat):
    """x_sbd: (S, B, D); w_cat: (D, 8H); b_cat: (1, 8H) -> (S, B, 8H)."""
    S, B, D = x_sbd.shape
    G2 = w_cat.shape[1]
    M = S * B
    x2 = x_sbd.reshape(M, D)
    TM = _pick_row_tile(M)
    xp = pl.pallas_call(
        _proj1_kernel,
        grid=(pl.cdiv(M, TM),),
        in_specs=[
            pl.BlockSpec((TM, D), lambda i: (i, 0)),
            pl.BlockSpec((D, G2), lambda i: (0, 0)),
            pl.BlockSpec((1, G2), lambda i: (0, 0)),
        ],
        out_specs=pl.BlockSpec((TM, G2), lambda i: (i, 0)),
        out_shape=jax.ShapeDtypeStruct((M, G2), jnp.float32),
        compiler_params=pltpu.CompilerParams(dimension_semantics=("parallel",)),
    )(x2, w_cat, b_cat)
    return xp.reshape(S, B, G2)


def _fused_input_projection2(y_f, y_b, w_top, w_bot, b_cat):
    """Stacked layers: XP = y_f @ w_top + y_b @ w_bot + b  -> (S, B, 8H)."""
    S, B, H = y_f.shape
    G2 = w_top.shape[1]
    M = S * B
    TM = _pick_row_tile(M)
    xp = pl.pallas_call(
        _proj2_kernel,
        grid=(pl.cdiv(M, TM),),
        in_specs=[
            pl.BlockSpec((TM, H), lambda i: (i, 0)),
            pl.BlockSpec((TM, H), lambda i: (i, 0)),
            pl.BlockSpec((H, G2), lambda i: (0, 0)),
            pl.BlockSpec((H, G2), lambda i: (0, 0)),
            pl.BlockSpec((1, G2), lambda i: (0, 0)),
        ],
        out_specs=pl.BlockSpec((TM, G2), lambda i: (i, 0)),
        out_shape=jax.ShapeDtypeStruct((M, G2), jnp.float32),
        compiler_params=pltpu.CompilerParams(dimension_semantics=("parallel",)),
    )(y_f.reshape(M, H), y_b.reshape(M, H), w_top, w_bot, b_cat)
    return xp.reshape(S, B, G2)


def _bilstm_layer_scan(xp, whh_f, whh_b, h0_lay, c0_lay):
    """One layer, both directions, single time-grid pass.

    xp: (S, B, 8H) fused gate pre-activations (fwd gates | bwd gates)
    whh_f, whh_b: (H, 4H);  h0_lay, c0_lay: (2, B, H)  (dir 0 = fwd, 1 = bwd)
    Returns y_f, y_b: (S, B, H) and h_n, c_n: (2, B, H).
    """
    S, B, G2 = xp.shape
    G = G2 // 2
    H = whh_f.shape[0]

    if G % 128 == 0:
        # Fast path: slice the fwd/bwd gate halves purely via block indices.
        xp_f_arr, xp_b_arr = xp, xp
        xp_f_spec = pl.BlockSpec((1, B, G), lambda t: (t, 0, 0))
        xp_b_spec = pl.BlockSpec((1, B, G), lambda t: (S - 1 - t, 0, 1))
    else:
        # Fallback: split once at the wrapper (XLA slice), full-width blocks.
        xp_f_arr, xp_b_arr = xp[..., :G], xp[..., G:]
        xp_f_spec = pl.BlockSpec((1, B, G), lambda t: (t, 0, 0))
        xp_b_spec = pl.BlockSpec((1, B, G), lambda t: (S - 1 - t, 0, 0))

    y_f, y_b, h_n, c_n = pl.pallas_call(
        _bilstm_scan_kernel,
        grid=(S,),
        in_specs=[
            xp_f_spec,
            xp_b_spec,
            pl.BlockSpec((H, G), lambda t: (0, 0)),      # W_hh fwd stays resident
            pl.BlockSpec((H, G), lambda t: (0, 0)),      # W_hh bwd stays resident
            pl.BlockSpec((2, B, H), lambda t: (0, 0, 0)),
            pl.BlockSpec((2, B, H), lambda t: (0, 0, 0)),
        ],
        out_specs=[
            pl.BlockSpec((1, B, H), lambda t: (t, 0, 0)),
            pl.BlockSpec((1, B, H), lambda t: (S - 1 - t, 0, 0)),
            pl.BlockSpec((2, B, H), lambda t: (0, 0, 0)),
            pl.BlockSpec((2, B, H), lambda t: (0, 0, 0)),
        ],
        out_shape=[
            jax.ShapeDtypeStruct((S, B, H), jnp.float32),
            jax.ShapeDtypeStruct((S, B, H), jnp.float32),
            jax.ShapeDtypeStruct((2, B, H), jnp.float32),
            jax.ShapeDtypeStruct((2, B, H), jnp.float32),
        ],
        scratch_shapes=[pltpu.VMEM((B, H), jnp.float32)] * 4,
        compiler_params=pltpu.CompilerParams(dimension_semantics=("arbitrary",)),
    )(xp_f_arr, xp_b_arr, whh_f, whh_b, h0_lay, c0_lay)
    return y_f, y_b, h_n, c_n


def _bilstm_forward_impl(x, params, hidden):
    """x: (batch, seq, input_dim), batch_first=True like the PyTorch module.

    Returns (output, (h_n, c_n)) with
      output: (batch, seq, 2*hidden_dim)
      h_n, c_n: (num_layers*2, batch, hidden_dim)
    """
    B, S, _ = x.shape
    L = len(params)
    H = params[0]["w_hh"][0].shape[0]
    dtype = jnp.float32

    if hidden is None:
        h0 = jnp.zeros((2 * L, B, H), dtype)
        c0 = jnp.zeros((2 * L, B, H), dtype)
    else:
        h0, c0 = hidden
        h0 = h0.astype(dtype)
        c0 = c0.astype(dtype)

    x_sbd = jnp.transpose(x.astype(dtype), (1, 0, 2))   # time-major (S, B, D)

    y_f = y_b = None
    h_n, c_n = [], []
    for l in range(L):
        p = params[l]
        if l == 0:
            xp = _fused_input_projection(x_sbd, p["w_ih_cat"], p["bias_cat"])
        else:
            w_cat = p["w_ih_cat"]                        # (2H, 8H)
            xp = _fused_input_projection2(y_f, y_b, w_cat[:H], w_cat[H:],
                                          p["bias_cat"])
        y_f, y_b, hn, cn = _bilstm_layer_scan(
            xp, p["w_hh"][0], p["w_hh"][1], h0[2 * l:2 * l + 2], c0[2 * l:2 * l + 2]
        )
        h_n.append(hn)
        c_n.append(cn)

    out = jnp.concatenate([y_f, y_b], axis=-1)           # (S, B, 2H)
    out = jnp.transpose(out, (1, 0, 2))                  # (B, S, 2H)
    return out, (jnp.concatenate(h_n, 0), jnp.concatenate(c_n, 0))


bilstm_forward = jax.jit(_bilstm_forward_impl)


# ----------------------------------------------------------------------------
# Parameter init (mirrors nn.LSTM: uniform(-1/sqrt(H), 1/sqrt(H)))
# ----------------------------------------------------------------------------
def init_bilstm_params(key, input_dim, hidden_dim, num_layers):
    params = []
    H = hidden_dim
    bound = 1.0 / np.sqrt(H)
    for l in range(num_layers):
        d_in = input_dim if l == 0 else 2 * H
        w_ih_list, w_hh_list, b_list = [], [], []
        for _d in range(2):  # forward, backward
            key, k1, k2, k3, k4 = jax.random.split(key, 5)
            w_ih = jax.random.uniform(k1, (4 * H, d_in), jnp.float32, -bound, bound)
            w_hh = jax.random.uniform(k2, (4 * H, H), jnp.float32, -bound, bound)
            b_ih = jax.random.uniform(k3, (4 * H,), jnp.float32, -bound, bound)
            b_hh = jax.random.uniform(k4, (4 * H,), jnp.float32, -bound, bound)
            w_ih_list.append(w_ih.T)                     # (d_in, 4H)
            w_hh_list.append(w_hh.T)                     # (H, 4H)
            b_list.append(b_ih + b_hh)                   # (4H,)
        params.append({
            "w_ih_cat": jnp.concatenate(w_ih_list, axis=1),   # (d_in, 8H)
            "w_hh": w_hh_list,                                 # [(H,4H), (H,4H)]
            "bias_cat": jnp.concatenate(b_list)[None, :],      # (1, 8H)
        })
    return params


# ----------------------------------------------------------------------------
# Pure NumPy reference (exact f32) for the correctness check
# ----------------------------------------------------------------------------
def _np_sigmoid(v):
    return 1.0 / (1.0 + np.exp(-v))


def bilstm_reference_np(x, params, hidden=None):
    x = np.asarray(x, dtype=np.float32)
    B, S, _ = x.shape
    H = np.asarray(params[0]["w_hh"][0]).shape[0]
    G = 4 * H
    L = len(params)
    if hidden is None:
        h0 = np.zeros((2 * L, B, H), np.float32)
        c0 = np.zeros((2 * L, B, H), np.float32)
    else:
        h0, c0 = np.asarray(hidden[0]), np.asarray(hidden[1])
    xs = np.transpose(x, (1, 0, 2))
    hns, cns = [], []
    for l in range(L):
        p = params[l]
        w_ih_cat = np.asarray(p["w_ih_cat"])
        bias_cat = np.asarray(p["bias_cat"])
        outs = []
        for d, rev in ((0, False), (1, True)):
            w_ih_t = w_ih_cat[:, d * G:(d + 1) * G]
            bias = bias_cat[:, d * G:(d + 1) * G]
            w_hh_t = np.asarray(p["w_hh"][d])
            h = h0[2 * l + d].copy()
            c = c0[2 * l + d].copy()
            ys = [None] * S
            order = range(S - 1, -1, -1) if rev else range(S)
            for t in order:
                gates = xs[t] @ w_ih_t + h @ w_hh_t + bias
                i_g = _np_sigmoid(gates[:, 0 * H:1 * H])
                f_g = _np_sigmoid(gates[:, 1 * H:2 * H])
                g_g = np.tanh(gates[:, 2 * H:3 * H])
                o_g = _np_sigmoid(gates[:, 3 * H:4 * H])
                c = f_g * c + i_g * g_g
                h = o_g * np.tanh(c)
                ys[t] = h
            outs.append(np.stack(ys, 0))
            hns.append(h)
            cns.append(c)
        xs = np.concatenate(outs, -1)
    return np.transpose(xs, (1, 0, 2)), (np.stack(hns, 0), np.stack(cns, 0))


# ----------------------------------------------------------------------------
# Main
# ----------------------------------------------------------------------------
if __name__ == "__main__":
    input_dim, hidden_dim, num_layers = 16, 32, 2   # 4H = 128 -> lane-dense gates
    batch, seq = 2, 8

    key = jax.random.PRNGKey(0)
    kx, kp = jax.random.split(key)
    x = jax.random.normal(kx, (batch, seq, input_dim), dtype=jnp.float32)
    params = init_bilstm_params(kp, input_dim, hidden_dim, num_layers)

    out, (h_n, c_n) = bilstm_forward(x, params, None)
    out = jax.block_until_ready(out)
    h_n = jax.block_until_ready(h_n)
    c_n = jax.block_until_ready(c_n)

    ref_out, (ref_h, ref_c) = bilstm_reference_np(np.asarray(x), params, None)
    # Loose-ish tolerance: the MXU's default f32 matmul precision differs
    # slightly from exact NumPy f32.
    np.testing.assert_allclose(np.asarray(out), ref_out, rtol=2e-2, atol=2e-2)
    np.testing.assert_allclose(np.asarray(h_n), ref_h, rtol=2e-2, atol=2e-2)
    np.testing.assert_allclose(np.asarray(c_n), ref_c, rtol=2e-2, atol=2e-2)

    assert out.shape == (batch, seq, 2 * hidden_dim)
    assert h_n.shape == (2 * num_layers, batch, hidden_dim)
    assert c_n.shape == (2 * num_layers, batch, hidden_dim)

    print("KERNEL_OK")
</pallas_src>

<mosaic_0001>
module attributes {stable_mosaic.version = 11 : i64} {
  func.func @_proj1_kernel(%arg0: i32, %arg1: memref<16x16xf32, #tpu.memory_space<vmem>>, %arg2: memref<16x256xf32, #tpu.memory_space<vmem>>, %arg3: memref<1x256xf32, #tpu.memory_space<vmem>>, %arg4: memref<16x256xf32, #tpu.memory_space<vmem>>) attributes {dimension_semantics = [#tpu.dimension_semantics<parallel>], iteration_bounds = array<i64: 1>, scalar_prefetch = 0 : i64, scratch_operands = 0 : i64, tpu.core_type = #tpu.core_type<tc>, window_params = [{transform_indices = @transform_0, window_bounds = array<i64: 16, 16>}, {pipeline_mode = #tpu.pipeline_mode<synchronous>, transform_indices = @transform_1, window_bounds = array<i64: 16, 256>}, {pipeline_mode = #tpu.pipeline_mode<synchronous>, transform_indices = @transform_2, window_bounds = array<i64: 1, 256>}, {transform_indices = @transform_3, window_bounds = array<i64: 16, 256>}]} {
    %c0 = arith.constant 0 : index
    %c0_0 = arith.constant 0 : index
    %0 = vector.load %arg1[%c0, %c0_0] : memref<16x16xf32, #tpu.memory_space<vmem>>, vector<16x16xf32>
    %c0_1 = arith.constant 0 : index
    %c0_2 = arith.constant 0 : index
    %1 = vector.load %arg2[%c0_1, %c0_2] : memref<16x256xf32, #tpu.memory_space<vmem>>, vector<16x256xf32>
    %cst = arith.constant dense<0.000000e+00> : vector<16x256xf32>
    %2 = tpu.matmul %0, %1, %cst {dimension_numbers = #tpu.dot_dimension_numbers<[1], [0], [0], [1], [0, 0, 1, 1], [], []>} : vector<16x16xf32>, vector<16x256xf32>, vector<16x256xf32> -> vector<16x256xf32>
    %c0_3 = arith.constant 0 : index
    %c0_4 = arith.constant 0 : index
    %3 = vector.load %arg3[%c0_3, %c0_4] : memref<1x256xf32, #tpu.memory_space<vmem>>, vector<1x256xf32>
    %4 = vector.broadcast %3 : vector<1x256xf32> to vector<16x256xf32>
    %5 = arith.addf %2, %4 : vector<16x256xf32>
    %c0_5 = arith.constant 0 : index
    %c0_6 = arith.constant 0 : index
    %6 = vector.load %arg4[%c0_5, %c0_6] : memref<16x256xf32, #tpu.memory_space<vmem>>, vector<16x256xf32>
    tpu.vector_store %arg4[%c0_5, %c0_6], %5 {strides = array<i32>} : memref<16x256xf32, #tpu.memory_space<vmem>>, vector<16x256xf32>,
    return
  }
  func.func @transform_0(%arg0: i32) -> (i32, i32) {
    %c0_i32 = arith.constant 0 : i32
    %c0_i32_0 = arith.constant 0 : i32
    return %arg0, %c0_i32 : i32, i32
  }
  func.func @transform_1(%arg0: i32) -> (i32, i32) {
    %c0_i32 = arith.constant 0 : i32
    %c0_i32_0 = arith.constant 0 : i32
    %c0_i32_1 = arith.constant 0 : i32
    return %c0_i32, %c0_i32_0 : i32, i32
  }
  func.func @transform_2(%arg0: i32) -> (i32, i32) {
    %c0_i32 = arith.constant 0 : i32
    %c0_i32_0 = arith.constant 0 : i32
    %c0_i32_1 = arith.constant 0 : i32
    return %c0_i32, %c0_i32_0 : i32, i32
  }
  func.func @transform_3(%arg0: i32) -> (i32, i32) {
    %c0_i32 = arith.constant 0 : i32
    %c0_i32_0 = arith.constant 0 : i32
    return %arg0, %c0_i32 : i32, i32
  }
}

module attributes {stable_mosaic.version = 11 : i64} {
  func.func @_bilstm_scan_kernel(%arg0: i32, %arg1: memref<1x2x128xf32, #tpu.memory_space<vmem>>, %arg2: memref<1x2x128xf32, #tpu.memory_space<vmem>>, %arg3: memref<32x128xf32, #tpu.memory_space<vmem>>, %arg4: memref<32x128xf32, #tpu.memory_space<vmem>>, %arg5: memref<2x2x32xf32, #tpu.memory_space<vmem>>, %arg6: memref<2x2x32xf32, #tpu.memory_space<vmem>>, %arg7: memref<1x2x32xf32, #tpu.memory_space<vmem>>, %arg8: memref<1x2x32xf32, #tpu.memory_space<vmem>>, %arg9: memref<2x2x32xf32, #tpu.memory_space<vmem>>, %arg10: memref<2x2x32xf32, #tpu.memory_space<vmem>>, %arg11: memref<2x32xf32, #tpu.memory_space<vmem>>, %arg12: memref<2x32xf32, #tpu.memory_space<vmem>>, %arg13: memref<2x32xf32, #tpu.memory_space<vmem>>, %arg14: memref<2x32xf32, #tpu.memory_space<vmem>>) attributes {dimension_semantics = [#tpu.dimension_semantics<arbitrary>], iteration_bounds = array<i64: 8>, scalar_prefetch = 0 : i64, scratch_operands = 4 : i64, tpu.core_type = #tpu.core_type<tc>, window_params = [{transform_indices = @transform_0, window_bounds = array<i64: 1, 2, 128>}, {transform_indices = @transform_1, window_bounds = array<i64: 1, 2, 128>}, {pipeline_mode = #tpu.pipeline_mode<synchronous>, transform_indices = @transform_2, window_bounds = array<i64: 32, 128>}, {pipeline_mode = #tpu.pipeline_mode<synchronous>, transform_indices = @transform_3, window_bounds = array<i64: 32, 128>}, {pipeline_mode = #tpu.pipeline_mode<synchronous>, transform_indices = @transform_4, window_bounds = array<i64: 2, 2, 32>}, {pipeline_mode = #tpu.pipeline_mode<synchronous>, transform_indices = @transform_5, window_bounds = array<i64: 2, 2, 32>}, {transform_indices = @transform_6, window_bounds = array<i64: 1, 2, 32>}, {transform_indices = @transform_7, window_bounds = array<i64: 1, 2, 32>}, {pipeline_mode = #tpu.pipeline_mode<synchronous>, transform_indices = @transform_8, window_bounds = array<i64: 2, 2, 32>}, {pipeline_mode = #tpu.pipeline_mode<synchronous>, transform_indices = @transform_9, window_bounds = array<i64: 2, 2, 32>}]} {
    %c0_i32 = arith.constant 0 : i32
    %0 = arith.cmpi eq, %arg0, %c0_i32 : i32
    %1 = arith.extui %0 : i1 to i32
    %c0_i32_0 = arith.constant 0 : i32
    %2 = arith.cmpi ne, %1, %c0_i32_0 : i32
    scf.if %2 {
      %c0_40 = arith.constant 0 : index
      %c0_41 = arith.constant 0 : index
      %c0_42 = arith.constant 0 : index
      %80 = vector.load %arg5[%c0_40, %c0_41, %c0_42] : memref<2x2x32xf32, #tpu.memory_space<vmem>>, vector<1x2x32xf32>
      %81 = vector.shape_cast %80 : vector<1x2x32xf32> to vector<2x32xf32>
      %c0_43 = arith.constant 0 : index
      %c0_44 = arith.constant 0 : index
      %82 = vector.load %arg11[%c0_43, %c0_44] : memref<2x32xf32, #tpu.memory_space<vmem>>, vector<2x32xf32>
      tpu.vector_store %arg11[%c0_43, %c0_44], %81 {strides = array<i32>} : memref<2x32xf32, #tpu.memory_space<vmem>>, vector<2x32xf32>,
      %c0_45 = arith.constant 0 : index
      %c0_46 = arith.constant 0 : index
      %c0_47 = arith.constant 0 : index
      %83 = vector.load %arg6[%c0_45, %c0_46, %c0_47] : memref<2x2x32xf32, #tpu.memory_space<vmem>>, vector<1x2x32xf32>
      %84 = vector.shape_cast %83 : vector<1x2x32xf32> to vector<2x32xf32>
      %c0_48 = arith.constant 0 : index
      %c0_49 = arith.constant 0 : index
      %85 = vector.load %arg12[%c0_48, %c0_49] : memref<2x32xf32, #tpu.memory_space<vmem>>, vector<2x32xf32>
      tpu.vector_store %arg12[%c0_48, %c0_49], %84 {strides = array<i32>} : memref<2x32xf32, #tpu.memory_space<vmem>>, vector<2x32xf32>,
      %c1 = arith.constant 1 : index
      %c0_50 = arith.constant 0 : index
      %c0_51 = arith.constant 0 : index
      %86 = vector.load %arg5[%c1, %c0_50, %c0_51] : memref<2x2x32xf32, #tpu.memory_space<vmem>>, vector<1x2x32xf32>
      %87 = vector.shape_cast %86 : vector<1x2x32xf32> to vector<2x32xf32>
      %c0_52 = arith.constant 0 : index
      %c0_53 = arith.constant 0 : index
      %88 = vector.load %arg13[%c0_52, %c0_53] : memref<2x32xf32, #tpu.memory_space<vmem>>, vector<2x32xf32>
      tpu.vector_store %arg13[%c0_52, %c0_53], %87 {strides = array<i32>} : memref<2x32xf32, #tpu.memory_space<vmem>>, vector<2x32xf32>,
      %c1_54 = arith.constant 1 : index
      %c0_55 = arith.constant 0 : index
      %c0_56 = arith.constant 0 : index
      %89 = vector.load %arg6[%c1_54, %c0_55, %c0_56] : memref<2x2x32xf32, #tpu.memory_space<vmem>>, vector<1x2x32xf32>
      %90 = vector.shape_cast %89 : vector<1x2x32xf32> to vector<2x32xf32>
      %c0_57 = arith.constant 0 : index
      %c0_58 = arith.constant 0 : index
      %91 = vector.load %arg14[%c0_57, %c0_58] : memref<2x32xf32, #tpu.memory_space<vmem>>, vector<2x32xf32>
      tpu.vector_store %arg14[%c0_57, %c0_58], %90 {strides = array<i32>} : memref<2x32xf32, #tpu.memory_space<vmem>>, vector<2x32xf32>,
    } else {
    }
    %c0 = arith.constant 0 : index
    %c0_1 = arith.constant 0 : index
    %c0_2 = arith.constant 0 : index
    %3 = vector.load %arg1[%c0, %c0_1, %c0_2] : memref<1x2x128xf32, #tpu.memory_space<vmem>>, vector<1x2x128xf32>
    %4 = vector.shape_cast %3 : vector<1x2x128xf32> to vector<2x128xf32>
    %c0_3 = arith.constant 0 : index
    %c0_4 = arith.constant 0 : index
    %5 = vector.load %arg11[%c0_3, %c0_4] : memref<2x32xf32, #tpu.memory_space<vmem>>, vector<2x32xf32>
    %c0_5 = arith.constant 0 : index
    %c0_6 = arith.constant 0 : index
    %6 = vector.load %arg12[%c0_5, %c0_6] : memref<2x32xf32, #tpu.memory_space<vmem>>, vector<2x32xf32>
    %c0_7 = arith.constant 0 : index
    %c0_8 = arith.constant 0 : index
    %7 = vector.load %arg3[%c0_7, %c0_8] : memref<32x128xf32, #tpu.memory_space<vmem>>, vector<32x128xf32>
    %cst = arith.constant dense<0.000000e+00> : vector<2x128xf32>
    %8 = tpu.matmul %5, %7, %cst {dimension_numbers = #tpu.dot_dimension_numbers<[1], [0], [0], [1], [0, 0, 1, 1], [], []>} : vector<2x32xf32>, vector<32x128xf32>, vector<2x128xf32> -> vector<2x128xf32>
    %9 = arith.addf %4, %8 : vector<2x128xf32>
    %10 = vector.extract_strided_slice %9 {offsets = [0, 0], sizes = [2, 32], strides = [1, 1]} : vector<2x128xf32> to vector<2x32xf32>
    %11 = arith.negf %10 : vector<2x32xf32>
    %12 = math.exp %11 : vector<2x32xf32>
    %cst_9 = arith.constant 1.000000e+00 : f32
    %13 = vector.broadcast %cst_9 : f32 to vector<2x32xf32>
    %14 = arith.addf %13, %12 : vector<2x32xf32>
    %15 = arith.divf %13, %14 : vector<2x32xf32>
    %16 = vector.extract_strided_slice %9 {offsets = [0, 32], sizes = [2, 32], strides = [1, 1]} : vector<2x128xf32> to vector<2x32xf32>
    %17 = arith.negf %16 : vector<2x32xf32>
    %18 = math.exp %17 : vector<2x32xf32>
    %cst_10 = arith.constant 1.000000e+00 : f32
    %19 = vector.broadcast %cst_10 : f32 to vector<2x32xf32>
    %20 = arith.addf %19, %18 : vector<2x32xf32>
    %21 = arith.divf %19, %20 : vector<2x32xf32>
    %22 = vector.extract_strided_slice %9 {offsets = [0, 64], sizes = [2, 32], strides = [1, 1]} : vector<2x128xf32> to vector<2x32xf32>
    %23 = math.tanh %22 : vector<2x32xf32>
    %24 = vector.extract_strided_slice %9 {offsets = [0, 96], sizes = [2, 32], strides = [1, 1]} : vector<2x128xf32> to vector<2x32xf32>
    %25 = arith.negf %24 : vector<2x32xf32>
    %26 = math.exp %25 : vector<2x32xf32>
    %cst_11 = arith.constant 1.000000e+00 : f32
    %27 = vector.broadcast %cst_11 : f32 to vector<2x32xf32>
    %28 = arith.addf %27, %26 : vector<2x32xf32>
    %29 = arith.divf %27, %28 : vector<2x32xf32>
    %30 = arith.mulf %21, %6 : vector<2x32xf32>
    %31 = arith.mulf %15, %23 : vector<2x32xf32>
    %32 = arith.addf %30, %31 : vector<2x32xf32>
    %33 = math.tanh %32 : vector<2x32xf32>
    %34 = arith.mulf %29, %33 : vector<2x32xf32>
    %c0_12 = arith.constant 0 : index
    %c0_13 = arith.constant 0 : index
    %c0_14 = arith.constant 0 : index
    %35 = vector.load %arg2[%c0_12, %c0_13, %c0_14] : memref<1x2x128xf32, #tpu.memory_space<vmem>>, vector<1x2x128xf32>
    %36 = vector.shape_cast %35 : vector<1x2x128xf32> to vector<2x128xf32>
    %c0_15 = arith.constant 0 : index
    %c0_16 = arith.constant 0 : index
    %37 = vector.load %arg13[%c0_15, %c0_16] : memref<2x32xf32, #tpu.memory_space<vmem>>, vector<2x32xf32>
    %c0_17 = arith.constant 0 : index
    %c0_18 = arith.constant 0 : index
    %38 = vector.load %arg14[%c0_17, %c0_18] : memref<2x32xf32, #tpu.memory_space<vmem>>, vector<2x32xf32>
    %c0_19 = arith.constant 0 : index
    %c0_20 = arith.constant 0 : index
    %39 = vector.load %arg4[%c0_19, %c0_20] : memref<32x128xf32, #tpu.memory_space<vmem>>, vector<32x128xf32>
    %cst_21 = arith.constant dense<0.000000e+00> : vector<2x128xf32>
    %40 = tpu.matmul %37, %39, %cst_21 {dimension_numbers = #tpu.dot_dimension_numbers<[1], [0], [0], [1], [0, 0, 1, 1], [], []>} : vector<2x32xf32>, vector<32x128xf32>, vector<2x128xf32> -> vector<2x128xf32>
    %41 = arith.addf %36, %40 : vector<2x128xf32>
    %42 = vector.extract_strided_slice %41 {offsets = [0, 0], sizes = [2, 32], strides = [1, 1]} : vector<2x128xf32> to vector<2x32xf32>
    %43 = arith.negf %42 : vector<2x32xf32>
    %44 = math.exp %43 : vector<2x32xf32>
    %cst_22 = arith.constant 1.000000e+00 : f32
    %45 = vector.broadcast %cst_22 : f32 to vector<2x32xf32>
    %46 = arith.addf %45, %44 : vector<2x32xf32>
    %47 = arith.divf %45, %46 : vector<2x32xf32>
    %48 = vector.extract_strided_slice %41 {offsets = [0, 32], sizes = [2, 32], strides = [1, 1]} : vector<2x128xf32> to vector<2x32xf32>
    %49 = arith.negf %48 : vector<2x32xf32>
    %50 = math.exp %49 : vector<2x32xf32>
    %cst_23 = arith.constant 1.000000e+00 : f32
    %51 = vector.broadcast %cst_23 : f32 to vector<2x32xf32>
    %52 = arith.addf %51, %50 : vector<2x32xf32>
    %53 = arith.divf %51, %52 : vector<2x32xf32>
    %54 = vector.extract_strided_slice %41 {offsets = [0, 64], sizes = [2, 32], strides = [1, 1]} : vector<2x128xf32> to vector<2x32xf32>
    %55 = math.tanh %54 : vector<2x32xf32>
    %56 = vector.extract_strided_slice %41 {offsets = [0, 96], sizes = [2, 32], strides = [1, 1]} : vector<2x128xf32> to vector<2x32xf32>
    %57 = arith.negf %56 : vector<2x32xf32>
    %58 = math.exp %57 : vector<2x32xf32>
    %cst_24 = arith.constant 1.000000e+00 : f32
    %59 = vector.broadcast %cst_24 : f32 to vector<2x32xf32>
    %60 = arith.addf %59, %58 : vector<2x32xf32>
    %61 = arith.divf %59, %60 : vector<2x32xf32>
    %62 = arith.mulf %53, %38 : vector<2x32xf32>
    %63 = arith.mulf %47, %55 : vector<2x32xf32>
    %64 = arith.addf %62, %63 : vector<2x32xf32>
    %65 = math.tanh %64 : vector<2x32xf32>
    %66 = arith.mulf %61, %65 : vector<2x32xf32>
    %c0_25 = arith.constant 0 : index
    %c0_26 = arith.constant 0 : index
    %67 = vector.load %arg11[%c0_25, %c0_26] : memref<2x32xf32, #tpu.memory_space<vmem>>, vector<2x32xf32>
    tpu.vector_store %arg11[%c0_25, %c0_26], %34 {strides = array<i32>} : memref<2x32xf32, #tpu.memory_space<vmem>>, vector<2x32xf32>,
    %c0_27 = arith.constant 0 : index
    %c0_28 = arith.constant 0 : index
    %68 = vector.load %arg12[%c0_27, %c0_28] : memref<2x32xf32, #tpu.memory_space<vmem>>, vector<2x32xf32>
    tpu.vector_store %arg12[%c0_27, %c0_28], %32 {strides = array<i32>} : memref<2x32xf32, #tpu.memory_space<vmem>>, vector<2x32xf32>,
    %c0_29 = arith.constant 0 : index
    %c0_30 = arith.constant 0 : index
    %69 = vector.load %arg13[%c0_29, %c0_30] : memref<2x32xf32, #tpu.memory_space<vmem>>, vector<2x32xf32>
    tpu.vector_store %arg13[%c0_29, %c0_30], %66 {strides = array<i32>} : memref<2x32xf32, #tpu.memory_space<vmem>>, vector<2x32xf32>,
    %c0_31 = arith.constant 0 : index
    %c0_32 = arith.constant 0 : index
    %70 = vector.load %arg14[%c0_31, %c0_32] : memref<2x32xf32, #tpu.memory_space<vmem>>, vector<2x32xf32>
    tpu.vector_store %arg14[%c0_31, %c0_32], %64 {strides = array<i32>} : memref<2x32xf32, #tpu.memory_space<vmem>>, vector<2x32xf32>,
    %c0_33 = arith.constant 0 : index
    %c0_34 = arith.constant 0 : index
    %c0_35 = arith.constant 0 : index
    %71 = vector.load %arg7[%c0_33, %c0_34, %c0_35] : memref<1x2x32xf32, #tpu.memory_space<vmem>>, vector<1x2x32xf32>
    %72 = vector.shape_cast %71 : vector<1x2x32xf32> to vector<2x32xf32>
    %73 = vector.shape_cast %34 : vector<2x32xf32> to vector<1x2x32xf32>
    tpu.vector_store %arg7[%c0_33, %c0_34, %c0_35], %73 {strides = array<i32>} : memref<1x2x32xf32, #tpu.memory_space<vmem>>, vector<1x2x32xf32>,
    %c0_36 = arith.constant 0 : index
    %c0_37 = arith.constant 0 : index
    %c0_38 = arith.constant 0 : index
    %74 = vector.load %arg8[%c0_36, %c0_37, %c0_38] : memref<1x2x32xf32, #tpu.memory_space<vmem>>, vector<1x2x32xf32>
    %75 = vector.shape_cast %74 : vector<1x2x32xf32> to vector<2x32xf32>
    %76 = vector.shape_cast %66 : vector<2x32xf32> to vector<1x2x32xf32>
    tpu.vector_store %arg8[%c0_36, %c0_37, %c0_38], %76 {strides = array<i32>} : memref<1x2x32xf32, #tpu.memory_space<vmem>>, vector<1x2x32xf32>,
    %c7_i32 = arith.constant 7 : i32
    %77 = arith.cmpi eq, %arg0, %c7_i32 : i32
    %78 = arith.extui %77 : i1 to i32
    %c0_i32_39 = arith.constant 0 : i32
    %79 = arith.cmpi ne, %78, %c0_i32_39 : i32
    scf.if %79 {
      %c0_40 = arith.constant 0 : index
      %c0_41 = arith.constant 0 : index
      %c0_42 = arith.constant 0 : index
      %80 = vector.load %arg9[%c0_40, %c0_41, %c0_42] : memref<2x2x32xf32, #tpu.memory_space<vmem>>, vector<1x2x32xf32>
      %81 = vector.shape_cast %80 : vector<1x2x32xf32> to vector<2x32xf32>
      %82 = vector.shape_cast %34 : vector<2x32xf32> to vector<1x2x32xf32>
      tpu.vector_store %arg9[%c0_40, %c0_41, %c0_42], %82 {strides = array<i32>} : memref<2x2x32xf32, #tpu.memory_space<vmem>>, vector<1x2x32xf32>,
      %c1 = arith.constant 1 : index
      %c0_43 = arith.constant 0 : index
      %c0_44 = arith.constant 0 : index
      %83 = vector.load %arg9[%c1, %c0_43, %c0_44] : memref<2x2x32xf32, #tpu.memory_space<vmem>>, vector<1x2x32xf32>
      %84 = vector.shape_cast %83 : vector<1x2x32xf32> to vector<2x32xf32>
      %85 = vector.shape_cast %66 : vector<2x32xf32> to vector<1x2x32xf32>
      tpu.vector_store %arg9[%c1, %c0_43, %c0_44], %85 {strides = array<i32>} : memref<2x2x32xf32, #tpu.memory_space<vmem>>, vector<1x2x32xf32>,
      %c0_45 = arith.constant 0 : index
      %c0_46 = arith.constant 0 : index
      %c0_47 = arith.constant 0 : index
      %86 = vector.load %arg10[%c0_45, %c0_46, %c0_47] : memref<2x2x32xf32, #tpu.memory_space<vmem>>, vector<1x2x32xf32>
      %87 = vector.shape_cast %86 : vector<1x2x32xf32> to vector<2x32xf32>
      %88 = vector.shape_cast %32 : vector<2x32xf32> to vector<1x2x32xf32>
      tpu.vector_store %arg10[%c0_45, %c0_46, %c0_47], %88 {strides = array<i32>} : memref<2x2x32xf32, #tpu.memory_space<vmem>>, vector<1x2x32xf32>,
      %c1_48 = arith.constant 1 : index
      %c0_49 = arith.constant 0 : index
      %c0_50 = arith.constant 0 : index
      %89 = vector.load %arg10[%c1_48, %c0_49, %c0_50] : memref<2x2x32xf32, #tpu.memory_space<vmem>>, vector<1x2x32xf32>
      %90 = vector.shape_cast %89 : vector<1x2x32xf32> to vector<2x32xf32>
      %91 = vector.shape_cast %64 : vector<2x32xf32> to vector<1x2x32xf32>
      tpu.vector_store %arg10[%c1_48, %c0_49, %c0_50], %91 {strides = array<i32>} : memref<2x2x32xf32, #tpu.memory_space<vmem>>, vector<1x2x32xf32>,
    } else {
    }
    return
  }
  func.func @transform_0(%arg0: i32) -> (i32, i32, i32) {
    %c0_i32 = arith.constant 0 : i32
    %c0_i32_0 = arith.constant 0 : i32
    %c0_i32_1 = arith.constant 0 : i32
    return %arg0, %c0_i32, %c0_i32_0 : i32, i32, i32
  }
  func.func @transform_1(%arg0: i32) -> (i32, i32, i32) {
    %c7_i32 = arith.constant 7 : i32
    %0 = arith.subi %c7_i32, %arg0 : i32
    %c0_i32 = arith.constant 0 : i32
    %c1_i32 = arith.constant 1 : i32
    %c0_i32_0 = arith.constant 0 : i32
    return %0, %c0_i32, %c1_i32 : i32, i32, i32
  }
  func.func @transform_2(%arg0: i32) -> (i32, i32) {
    %c0_i32 = arith.constant 0 : i32
    %c0_i32_0 = arith.constant 0 : i32
    %c0_i32_1 = arith.constant 0 : i32
    return %c0_i32, %c0_i32_0 : i32, i32
  }
  func.func @transform_3(%arg0: i32) -> (i32, i32) {
    %c0_i32 = arith.constant 0 : i32
    %c0_i32_0 = arith.constant 0 : i32
    %c0_i32_1 = arith.constant 0 : i32
    return %c0_i32, %c0_i32_0 : i32, i32
  }
  func.func @transform_4(%arg0: i32) -> (i32, i32, i32) {
    %c0_i32 = arith.constant 0 : i32
    %c0_i32_0 = arith.constant 0 : i32
    %c0_i32_1 = arith.constant 0 : i32
    %c0_i32_2 = arith.constant 0 : i32
    return %c0_i32, %c0_i32_0, %c0_i32_1 : i32, i32, i32
  }
  func.func @transform_5(%arg0: i32) -> (i32, i32, i32) {
    %c0_i32 = arith.constant 0 : i32
    %c0_i32_0 = arith.constant 0 : i32
    %c0_i32_1 = arith.constant 0 : i32
    %c0_i32_2 = arith.constant 0 : i32
    return %c0_i32, %c0_i32_0, %c0_i32_1 : i32, i32, i32
  }
  func.func @transform_6(%arg0: i32) -> (i32, i32, i32) {
    %c0_i32 = arith.constant 0 : i32
    %c0_i32_0 = arith.constant 0 : i32
    %c0_i32_1 = arith.constant 0 : i32
    return %arg0, %c0_i32, %c0_i32_0 : i32, i32, i32
  }
  func.func @transform_7(%arg0: i32) -> (i32, i32, i32) {
    %c7_i32 = arith.constant 7 : i32
    %0 = arith.subi %c7_i32, %arg0 : i32
    %c0_i32 = arith.constant 0 : i32
    %c0_i32_0 = arith.constant 0 : i32
    %c0_i32_1 = arith.constant 0 : i32
    return %0, %c0_i32, %c0_i32_0 : i32, i32, i32
  }
  func.func @transform_8(%arg0: i32) -> (i32, i32, i32) {
    %c0_i32 = arith.constant 0 : i32
    %c0_i32_0 = arith.constant 0 : i32
    %c0_i32_1 = arith.constant 0 : i32
    %c0_i32_2 = arith.constant 0 : i32
    return %c0_i32, %c0_i32_0, %c0_i32_1 : i32, i32, i32
  }
  func.func @transform_9(%arg0: i32) -> (i32, i32, i32) {
    %c0_i32 = arith.constant 0 : i32
    %c0_i32_0 = arith.constant 0 : i32
    %c0_i32_1 = arith.constant 0 : i32
    %c0_i32_2 = arith.constant 0 : i32
    return %c0_i32, %c0_i32_0, %c0_i32_1 : i32, i32, i32
  }
}

module attributes {stable_mosaic.version = 11 : i64} {
  func.func @_proj2_kernel(%arg0: i32, %arg1: memref<16x32xf32, #tpu.memory_space<vmem>>, %arg2: memref<16x32xf32, #tpu.memory_space<vmem>>, %arg3: memref<32x256xf32, #tpu.memory_space<vmem>>, %arg4: memref<32x256xf32, #tpu.memory_space<vmem>>, %arg5: memref<1x256xf32, #tpu.memory_space<vmem>>, %arg6: memref<16x256xf32, #tpu.memory_space<vmem>>) attributes {dimension_semantics = [#tpu.dimension_semantics<parallel>], iteration_bounds = array<i64: 1>, scalar_prefetch = 0 : i64, scratch_operands = 0 : i64, tpu.core_type = #tpu.core_type<tc>, window_params = [{transform_indices = @transform_0, window_bounds = array<i64: 16, 32>}, {transform_indices = @transform_1, window_bounds = array<i64: 16, 32>}, {pipeline_mode = #tpu.pipeline_mode<synchronous>, transform_indices = @transform_2, window_bounds = array<i64: 32, 256>}, {pipeline_mode = #tpu.pipeline_mode<synchronous>, transform_indices = @transform_3, window_bounds = array<i64: 32, 256>}, {pipeline_mode = #tpu.pipeline_mode<synchronous>, transform_indices = @transform_4, window_bounds = array<i64: 1, 256>}, {transform_indices = @transform_5, window_bounds = array<i64: 16, 256>}]} {
    %c0 = arith.constant 0 : index
    %c0_0 = arith.constant 0 : index
    %0 = vector.load %arg1[%c0, %c0_0] : memref<16x32xf32, #tpu.memory_space<vmem>>, vector<16x32xf32>
    %c0_1 = arith.constant 0 : index
    %c0_2 = arith.constant 0 : index
    %1 = vector.load %arg3[%c0_1, %c0_2] : memref<32x256xf32, #tpu.memory_space<vmem>>, vector<32x256xf32>
    %cst = arith.constant dense<0.000000e+00> : vector<16x256xf32>
    %2 = tpu.matmul %0, %1, %cst {dimension_numbers = #tpu.dot_dimension_numbers<[1], [0], [0], [1], [0, 0, 1, 1], [], []>} : vector<16x32xf32>, vector<32x256xf32>, vector<16x256xf32> -> vector<16x256xf32>
    %c0_3 = arith.constant 0 : index
    %c0_4 = arith.constant 0 : index
    %3 = vector.load %arg2[%c0_3, %c0_4] : memref<16x32xf32, #tpu.memory_space<vmem>>, vector<16x32xf32>
    %c0_5 = arith.constant 0 : index
    %c0_6 = arith.constant 0 : index
    %4 = vector.load %arg4[%c0_5, %c0_6] : memref<32x256xf32, #tpu.memory_space<vmem>>, vector<32x256xf32>
    %cst_7 = arith.constant dense<0.000000e+00> : vector<16x256xf32>
    %5 = tpu.matmul %3, %4, %cst_7 {dimension_numbers = #tpu.dot_dimension_numbers<[1], [0], [0], [1], [0, 0, 1, 1], [], []>} : vector<16x32xf32>, vector<32x256xf32>, vector<16x256xf32> -> vector<16x256xf32>
    %6 = arith.addf %2, %5 : vector<16x256xf32>
    %c0_8 = arith.constant 0 : index
    %c0_9 = arith.constant 0 : index
    %7 = vector.load %arg5[%c0_8, %c0_9] : memref<1x256xf32, #tpu.memory_space<vmem>>, vector<1x256xf32>
    %8 = vector.broadcast %7 : vector<1x256xf32> to vector<16x256xf32>
    %9 = arith.addf %6, %8 : vector<16x256xf32>
    %c0_10 = arith.constant 0 : index
    %c0_11 = arith.constant 0 : index
    %10 = vector.load %arg6[%c0_10, %c0_11] : memref<16x256xf32, #tpu.memory_space<vmem>>, vector<16x256xf32>
    tpu.vector_store %arg6[%c0_10, %c0_11], %9 {strides = array<i32>} : memref<16x256xf32, #tpu.memory_space<vmem>>, vector<16x256xf32>,
    return
  }
  func.func @transform_0(%arg0: i32) -> (i32, i32) {
    %c0_i32 = arith.constant 0 : i32
    %c0_i32_0 = arith.constant 0 : i32
    return %arg0, %c0_i32 : i32, i32
  }
  func.func @transform_1(%arg0: i32) -> (i32, i32) {
    %c0_i32 = arith.constant 0 : i32
    %c0_i32_0 = arith.constant 0 : i32
    return %arg0, %c0_i32 : i32, i32
  }
  func.func @transform_2(%arg0: i32) -> (i32, i32) {
    %c0_i32 = arith.constant 0 : i32
    %c0_i32_0 = arith.constant 0 : i32
    %c0_i32_1 = arith.constant 0 : i32
    return %c0_i32, %c0_i32_0 : i32, i32
  }
  func.func @transform_3(%arg0: i32) -> (i32, i32) {
    %c0_i32 = arith.constant 0 : i32
    %c0_i32_0 = arith.constant 0 : i32
    %c0_i32_1 = arith.constant 0 : i32
    return %c0_i32, %c0_i32_0 : i32, i32
  }
  func.func @transform_4(%arg0: i32) -> (i32, i32) {
    %c0_i32 = arith.constant 0 : i32
    %c0_i32_0 = arith.constant 0 : i32
    %c0_i32_1 = arith.constant 0 : i32
    return %c0_i32, %c0_i32_0 : i32, i32
  }
  func.func @transform_5(%arg0: i32) -> (i32, i32) {
    %c0_i32 = arith.constant 0 : i32
    %c0_i32_0 = arith.constant 0 : i32
    return %arg0, %c0_i32 : i32, i32
  }
}

</mosaic_0001>

<bundles_post_ra>
// kernel: _bilstm_forward_impl.4
= control target key start
LH: loop header
LB: loop body
LE: loop exit
PB: predicated region body
PF: predicated region fallthrough
CT: control target
= control target key end

     0   :  { %v133_v3 = vmov 0.0   ;;  %vm32_vm0 = vcmask 130048   ;;  %v22_v9 = vlaneseq  ;;  %s187_s1 = inlined_call_operand.vmem [shape: f32[16,256], index: 1, kind: input, shape index: {}]   ;;  %s188_s0 = inlined_call_operand.vmem [shape: f32[16,16], index: 0, kind: input, shape index: {}]   ;;  %s189_s2 = inlined_call_operand.vmem [shape: f32[1,256], index: 2, kind: input, shape index: {}]   ;;  %s190_s3 = inlined_call_operand.vmem [shape: f32[16,256], index: 3, kind: output, shape index: {}]  }
   0x1   :  { %v17_v0 = vld [vmem:[%s187_s1 + $0x8] sm:$0xff]  ;;  %v19_v1 = vld [vmem:[%s187_s1 + $0x18] sm:$0xff]  ;;  %v16_v2 = vld [vmem:[%s187_s1] sm:$0xff]  ;;  %103 = vmatprep.mubr.f32.mxu0 %v133_v3  ;;  %109 = vmatprep.mubr.f32.mxu1 %v133_v3 }
   0x2   :  { %v126_v4 = vpack.c.bf16 %v19_v1, %v17_v0  ;;  %v18_v5 = vld [vmem:[%s187_s1 + $0x10] sm:$0xff]  ;;  %v14_v7 = vld [vmem:[%s188_s0] sm:$0xff]  ;;  %v15_v8 = vld [vmem:[%s188_s0 + $0x8] sm:$0xff]  ;;  %v23_v10 = vshrl.u32 %v22_v9, 7 }
   0x3   :  { %v128_v6 = vpack.c.bf16 %v18_v5, %v16_v2  ;;  %v20_v12 = vld [vmem:[%s189_s2] sm:$0x3] }
   0x4   :  { %127 = vmatprep.subr.bf16.mxu0 %v126_v4  ;;  %130 = vmatprep.subr.bf16.mxu1 %v126_v4  ;;  %v24_v11 = vsub.s32 0, %v23_v10  ;;  %v28_v13 = vsub.s32 1, %v23_v10 }
   0x5   :  { %129 = vmatpush1.bf16.msra.mxu0 %v128_v6  ;;  %131 = vmatpush1.bf16.msra.mxu1 %v128_v6 }
   0x6   :  { %v25_v14 = vrot.slane %v20_v12, %v24_v11  ;;  %v29_v15 = vrot.slane %v20_v12, %v28_v13 }
   0x8   :  { %124 = vmatmul.mubr.msk.f32.vlgmr.msra.gmra.mrb[0].mxu0 %vm32_vm0, %v14_v7  ;;  %125 = vmatmul.mubr.msk.f32.vlgmr.msra.gmra.mrb[0].mxu1 %vm32_vm0, %v15_v8 }
  0xdb   :  { %v105_v16 = vpop.f32.mrb[0].mxu0  ;;  %v111_v17 = vpop.f32.mrb[0].mxu1 }
  0xdc   :  { %v106_v18 = vadd.f32 %v105_v16, %v25_v14  ;;  %v112_v19 = vadd.f32 %v111_v17, %v25_v14  ;;  %v107_v20 = vpop.f32.mrb[1].mxu0  ;;  %v113_v21 = vpop.f32.mrb[1].mxu1 }
  0xdd   :  { %v108_v22 = vadd.f32 %v107_v20, %v29_v15  ;;  %v114_v23 = vadd.f32 %v113_v21, %v29_v15 }
  0xde   :  { %116 = vst [vmem:[%s190_s3] sm:$0xff] %v106_v18  ;;  %118 = vst [vmem:[%s190_s3 + $0x10] sm:$0xff] %v112_v19 }
  0xdf   :  { %117 = vst [vmem:[%s190_s3 + $0x8] sm:$0xff] %v108_v22  ;;  %119 = vst [vmem:[%s190_s3 + $0x18] sm:$0xff] %v114_v23 }

// kernel: _bilstm_forward_impl.6
= control target key start
LH: loop header
LB: loop body
LE: loop exit
PB: predicated region body
PF: predicated region fallthrough
CT: control target
= control target key end

     0   :  { %v256_v3 = vmov 0.0   ;;  %vm40_vm0 = vcmask 261120   ;;  %v209_v29 = vlaneseq  ;;  %s362_s3 = inlined_call_operand.vmem [shape: f32[32,256], index: 3, kind: input, shape index: {}]   ;;  %s363_s2 = inlined_call_operand.vmem [shape: f32[32,256], index: 2, kind: input, shape index: {}]   ;;  %s364_s1 = inlined_call_operand.vmem [shape: f32[16,32], index: 1, kind: input, shape index: {}]   ;;  %s365_s0 = inlined_call_operand.vmem [shape: f32[16,32], index: 0, kind: input, shape index: {}]   ;;  %s366_s4 = inlined_call_operand.vmem [shape: f32[1,256], index: 4, kind: input, shape index: {}]   ;;  %s367_s5 = inlined_call_operand.vmem [shape: f32[16,256], index: 5, kind: output, shape index: {}]  }
   0x1   :  { %v33_v0 = vld [vmem:[%s362_s3 + $0x8] sm:$0xff]  ;;  %v35_v1 = vld [vmem:[%s362_s3 + $0x18] sm:$0xff]  ;;  %111 = vmatprep.mubr.f32.mxu1 %v256_v3  ;;  %194 = vmatprep.mubr.f32.mxu0 %v256_v3  ;;  %v32_v6 = vld [vmem:[%s362_s3] sm:$0xff] }
   0x2   :  { %v23_v2 = vld [vmem:[%s363_s2 + $0x8] sm:$0xff]  ;;  %v235_v4 = vpack.c.bf16 %v35_v1, %v33_v0  ;;  %v25_v5 = vld [vmem:[%s363_s2 + $0x18] sm:$0xff]  ;;  %v34_v7 = vld [vmem:[%s362_s3 + $0x10] sm:$0xff]  ;;  %v210_v30 = vshrl.u32 %v209_v29, 7 }
   0x3   :  { %v243_v8 = vpack.c.bf16 %v25_v5, %v23_v2  ;;  %v237_v9 = vpack.c.bf16 %v34_v7, %v32_v6  ;;  %v22_v10 = vld [vmem:[%s363_s2] sm:$0xff]  ;;  %v24_v11 = vld [vmem:[%s363_s2 + $0x10] sm:$0xff]  ;;  %v37_v12 = vld [vmem:[%s362_s3 + $0x28] sm:$0xff] }
   0x4   :  { %236 = vmatprep.subr.bf16.mxu1 %v235_v4  ;;  %v245_v13 = vpack.c.bf16 %v24_v11, %v22_v10  ;;  %v39_v14 = vld [vmem:[%s362_s3 + $0x38] sm:$0xff]  ;;  %v27_v15 = vld [vmem:[%s363_s2 + $0x28] sm:$0xff]  ;;  %v36_v19 = vld [vmem:[%s362_s3 + $0x20] sm:$0xff]  ;;  %v211_v31 = vsub.s32 0, %v210_v30  ;;  %v215_v33 = vsub.s32 1, %v210_v30 }
   0x5   :  { %v29_v16 = vld [vmem:[%s363_s2 + $0x38] sm:$0xff]  ;;  %244 = vmatprep.subr.bf16.mxu0 %v243_v8  ;;  %238 = vmatpush1.bf16.msra.mxu1 %v237_v9  ;;  %v239_v17 = vpack.c.bf16 %v39_v14, %v37_v12  ;;  %v38_v20 = vld [vmem:[%s362_s3 + $0x30] sm:$0xff]  ;;  %v26_v21 = vld [vmem:[%s363_s2 + $0x20] sm:$0xff] }
   0x6   :  { %v247_v18 = vpack.c.bf16 %v29_v16, %v27_v15  ;;  %246 = vmatpush1.bf16.msra.mxu0 %v245_v13  ;;  %v241_v22 = vpack.c.bf16 %v38_v20, %v36_v19  ;;  %v28_v23 = vld [vmem:[%s363_s2 + $0x30] sm:$0xff]  ;;  %v30_v25 = vld [vmem:[%s364_s1] sm:$0xff]  ;;  %v31_v27 = vld [vmem:[%s364_s1 + $0x8] sm:$0xff] }
   0x7   :  { %240 = vmatprep.subr.bf16.mxu1 %v239_v17  ;;  %v249_v24 = vpack.c.bf16 %v28_v23, %v26_v21  ;;  %v20_v26 = vld [vmem:[%s365_s0] sm:$0xff]  ;;  %v21_v28 = vld [vmem:[%s365_s0 + $0x8] sm:$0xff] }
   0x8   :  { %248 = vmatprep.subr.bf16.mxu0 %v247_v18  ;;  %v207_v32 = vld [vmem:[%s366_s4] sm:$0x3] }
   0x9   :  { %242 = vmatpush1.bf16.msra.mxu1 %v241_v22  ;;  %v212_v35 = vrot.slane %v207_v32, %v211_v31  ;;  %v216_v38 = vrot.slane %v207_v32, %v215_v33 }
   0xa   :  { %250 = vmatpush1.bf16.msra.mxu0 %v249_v24 }
   0xc   :  { %231 = vmatmul.mubr.msk.f32.vlgmr.msra.gmra.mrb[0].mxu1 %vm40_vm0, %v30_v25 }
   0xd   :  { %233 = vmatmul.mubr.msk.f32.vlgmr.msra.gmra.mrb[0].mxu0 %vm40_vm0, %v20_v26  ;;  %117 = vmatprep.mubr.f32.mxu1 %v256_v3 }
   0xe   :  { %200 = vmatprep.mubr.f32.mxu0 %v256_v3 }
  0x10   :  { %232 = vmatmul.mubr.msk.f32.gmra.mrb[2].mxu1 %vm40_vm0, %v31_v27 }
  0x11   :  { %234 = vmatmul.mubr.msk.f32.gmra.mrb[2].mxu0 %vm40_vm0, %v21_v28 }
  0xdf   :  { %v113_v34 = vpop.f32.mrb[0].mxu1 }
  0xe0   :  { %v196_v36 = vpop.f32.mrb[0].mxu0  ;;  %v115_v37 = vpop.f32.mrb[1].mxu1 }
  0xe1   :  { %v197_v39 = vadd.f32 %v196_v36, %v113_v34  ;;  %v198_v40 = vpop.f32.mrb[1].mxu0 }
  0xe2   :  { %v199_v41 = vadd.f32 %v198_v40, %v115_v37 }
  0xe3   :  { %v219_v42 = vadd.f32 %v212_v35, %v197_v39  ;;  %v119_v43 = vpop.f32.mrb[2].mxu1 }
  0xe4   :  { %v220_v44 = vadd.f32 %v216_v38, %v199_v41  ;;  %v202_v45 = vpop.f32.mrb[2].mxu0  ;;  %v121_v46 = vpop.f32.mrb[3].mxu1 }
  0xe5   :  { %223 = vst [vmem:[%s367_s5] sm:$0xff] %v219_v42  ;;  %v203_v47 = vadd.f32 %v202_v45, %v119_v43  ;;  %v204_v48 = vpop.f32.mrb[3].mxu0 }
  0xe6   :  { %224 = vst [vmem:[%s367_s5 + $0x8] sm:$0xff] %v220_v44  ;;  %v205_v49 = vadd.f32 %v204_v48, %v121_v46 }
  0xe7   :  { %v221_v50 = vadd.f32 %v212_v35, %v203_v47 }
  0xe8   :  { %v222_v51 = vadd.f32 %v216_v38, %v205_v49 }
  0xe9   :  { %225 = vst [vmem:[%s367_s5 + $0x10] sm:$0xff] %v221_v50 }
  0xea   :  { %226 = vst [vmem:[%s367_s5 + $0x18] sm:$0xff] %v222_v51 }

// kernel: _bilstm_forward_impl.5
= control target key start
LH: loop header
LB: loop body
LE: loop exit
PB: predicated region body
PF: predicated region fallthrough
CT: control target
= control target key end

     0   :  { %s919_s30 = smov 0   ;;  %s1029_s0 = inlined_call_operand.vmem [shape: f32[8,2,256], index: 0, kind: input, shape index: {}, may-alias: {0,1}]   ;;  %s1030_s1 = inlined_call_operand.vmem [shape: f32[8,2,256], index: 1, kind: input, shape index: {}, may-alias: {0,1}]   ;;  %s1031_s2 = inlined_call_operand.vmem [shape: f32[32,128], index: 2, kind: input, shape index: {}]   ;;  %s1032_s3 = inlined_call_operand.vmem [shape: f32[32,128], index: 3, kind: input, shape index: {}]   ;;  %s1033_s4 = inlined_call_operand.vmem [shape: f32[2,2,32], index: 4, kind: input, shape index: {}, may-alias: {4,5}]   ;;  %s1034_s5 = inlined_call_operand.vmem [shape: f32[2,2,32], index: 5, kind: input, shape index: {}, may-alias: {4,5}]   ;;  %s1035_s6 = inlined_call_operand.vmem [shape: f32[8,2,32], index: 6, kind: output, shape index: {0}]   ;;  %s1036_s7 = inlined_call_operand.vmem [shape: f32[8,2,32], index: 7, kind: output, shape index: {1}]   ;;  %s1037_s8 = inlined_call_operand.vmem [shape: f32[2,2,32], index: 8, kind: output, shape index: {2}]   ;;  %s1038_s9 = inlined_call_operand.vmem [shape: f32[2,2,32], index: 9, kind: output, shape index: {3}]  }
   0x1 LB: > { %s925_s10 = sadd.s32 4294967295, %s861_s30   ;;  %p759_p0 = scmp.ge.s32.totalorder %s861_s30, 1  ;;  %s861_s30 = sphi %s919_s30, %s20_s30  }
   0x2   : > { %p301_p1 = scmp.lt.s32.totalorder %s861_s30, 9 }
   0x4   : > { %p302_p2 = pnand %p759_p0, %p301_p1 }
   0x5   : > { %p348_p3 = scmp.lt.s32.totalorder (!%p302_p2), %s925_s10, 7  ;;  %s353_s11 = ssub.s32 (!%p302_p2), 7, %s925_s10 }
   0x6   : > { %305 = sbr.rel (%p302_p2) target bundleno = 739 (0x2e3), region = 44  ;;  %p354_p4 = scmp.lt.s32.totalorder (!%p302_p2), %s353_s11, 7 }
   0x7   : > { %p766_p5 = scmp.ne.s32.totalorder (!%p302_p2), %s925_s10, 0 }
   0xd   : > { %s349_s12 = scalar_select %p348_p3, %s925_s10, 7 }
   0xe   : > { %s1040_s11 = smov (!%p354_p4, %s353_s11), 7  ;;  %374 = sbr.rel (%p766_p5) target bundleno = 21 (0x15), region = 48 }
   0xf   : > { %s779_s13 = sshll.u32 %s349_s12, 2  ;;  %s764_s14 = sshll.u32 %s349_s12, 1  ;;  %v375_v0 = vld [vmem:[%s1033_s4] sm:$0x3] (!%p766_p5)  ;;  %vm376_vm0 = vcmask (!%p766_p5), 254976  }
  0x10   : > { %s935_s17 = scalar_lea.vmem %s1029_s0, %s779_s13  ;;  %s780_s18 = sshll.u32 %s1040_s11, 2  ;;  %v378_v1 = vld [vmem:[%s1034_s5] sm:$0x3] (!%p766_p5)  ;;  %377 = vst.msk [vmem:[#allocation2] sm:$0x3] (!%p766_p5), %vm376_vm0, %v375_v0 }
  0x11   : > { %s940_s21 = scalar_lea.vmem %s1030_s1, %s780_s18  ;;  %s945_s24 = scalar_lea.vmem %s1035_s6, %s764_s14  ;;  %379 = vst.msk [vmem:[#allocation3] sm:$0x3] (!%p766_p5), %vm376_vm0, %v378_v1  ;;  %v767_v2 = vld [vmem:[%s1033_s4 + $0x2] sm:$0x3] (!%p766_p5) }
  0x12   : > { %s765_s25 = sshll.u32 %s1040_s11, 1  ;;  %v768_v3 = vld [vmem:[%s1034_s5 + $0x2] sm:$0x3] (!%p766_p5)  ;;  %382 = vst.msk [vmem:[#allocation4] sm:$0x3] (!%p766_p5), %vm376_vm0, %v767_v2 }
  0x13   : > { %s950_s28 = scalar_lea.vmem %s1036_s7, %s765_s25  ;;  %385 = vst.msk [vmem:[#allocation5] sm:$0x3] (!%p766_p5), %vm376_vm0, %v768_v3 }
  0x15 PF: > { %v389_v4 = vld [vmem:[%s1031_s2] sm:$0xff]  ;;  %v390_v5 = vld [vmem:[%s1031_s2 + $0x8] sm:$0xff]  ;;  %v863_v7 = vmov 0.0|0.0   ;;  %v391_v10 = vld [vmem:[%s1031_s2 + $0x10] sm:$0xff]  ;;  %vm864_vm1 = vmmov 0   ;;  %v865_v13 = vmov 0.0  }
  0x16   : > { %v499_v6 = vld [vmem:[%s1032_s3] sm:$0xff]  ;;  %813 = vmatprep.subr.bf16.mxu0 %v863_v7  ;;  %v814_v8 = vpack.c.bf16 %v390_v5, %v389_v4  ;;  %819 = vmatprep.subr.bf16.mxu1 %v863_v7  ;;  %v500_v9 = vld [vmem:[%s1032_s3 + $0x8] sm:$0xff]  ;;  %v392_v11 = vld [vmem:[%s1031_s2 + $0x18] sm:$0xff]  ;;  %s866_s20 = smov 32   ;;  %vm393_vm2 = vcmask 261120   ;;  %s867_s22 = smov 64  }
  0x17   : > { %v820_v12 = vpack.c.bf16 %v500_v9, %v499_v6  ;;  %799 = vmatprep.mubr.msk.f32.mxu0 %vm864_vm1, %v865_v13  ;;  %v501_v14 = vld [vmem:[%s1032_s3 + $0x10] sm:$0xff]  ;;  %v502_v15 = vld [vmem:[%s1032_s3 + $0x18] sm:$0xff]  ;;  %810 = vmatprep.mubr.msk.f32.mxu1 %vm864_vm1, %v865_v13  ;;  %v817_v16 = vpack.c.bf16 %v392_v11, %v391_v10  ;;  %v387_v20 = vld [vmem:[#allocation2] sm:$0x3]  ;;  %vm609_vm3 = vcmask 254976   ;;  %p774_p6 = scmp.ne.s32.totalorder %s925_s10, 7 }
  0x18   : > { %815 = vmatpush3.bf16.msra.mxu0 %v814_v8  ;;  %v388_v17 = vld [vmem:[#allocation3] sm:$0x3]  ;;  %v823_v18 = vpack.c.bf16 %v502_v15, %v501_v14  ;;  %v386_v22 = vld [vmem:[%s935_s17] sm:$0x3]  ;;  %s868_s17 = smov 96  }
  0x19   : > { %816 = vmatprep.subr.bf16.mxu0 %v863_v7  ;;  %821 = vmatpush3.bf16.msra.mxu1 %v820_v12  ;;  %v497_v21 = vld [vmem:[#allocation4] sm:$0x3]  ;;  %v771_v23 = vld [vmem:[%s940_s21 + $0x2] sm:$0x3] }
  0x1a   : > { %822 = vmatprep.subr.bf16.mxu1 %v863_v7  ;;  %476 = vrot.lane.b32.xlu1 %v388_v17, %s866_s20  ;;  %v498_v19 = vld [vmem:[#allocation5] sm:$0x3] }
  0x1c   : > { %818 = vmatpush3.bf16.msra.mxu0 %v817_v16 }
  0x1d   : > { %824 = vmatpush3.bf16.msra.mxu1 %v823_v18 }
  0x1e   : > { %585 = vrot.lane.b32.xlu1 %v498_v19, %s866_s20 }
  0x1f   : > { %800 = vmatmul.mubr.msk.f32.vlgmr.msra.gmra.mrb[0].mxu0 %vm393_vm2, %v387_v20 }
  0x20   : > { %811 = vmatmul.mubr.msk.f32.vlgmr.msra.gmra.mrb[0].mxu1 %vm393_vm2, %v497_v21 }
  0x8c   : > { %v477_v44 = vpop.permute.xlu1 %476 }
  0x90   : > { %v586_v46 = vpop.permute.xlu1 %585 }
  0xf2   : > { %v463_v24 = vpop.f32.mrb[0].mxu0 }
  0xf3   : > { %v467_v25 = vadd.f32 %v463_v24, %v386_v22  ;;  %v801_v26 = vpop.f32.mrb[1].mxu0  ;;  %v572_v27 = vpop.f32.mrb[0].mxu1 }
  0xf4   : > { %v576_v28 = vadd.f32 %v771_v23, %v572_v27  ;;  %v812_v29 = vpop.f32.mrb[1].mxu1 }
  0xf5   : > { %839 = vtanh.f32 %v467_v25  ;;  %v770_v32 = vmul.f32 -1.442695, %v467_v25 }
  0xf6   : > { %841 = vtanh.f32 %v576_v28  ;;  %v773_v33 = vmul.f32 -1.442695, %v576_v28 }
  0xf7   : > { %843 = vpow2.f32 %v770_v32 }
  0xf8   : > { %845 = vpow2.f32 %v773_v33 }
  0xff   : > { %v840_v30 = vpop.eup %839 }
 0x100   : > { %481 = vrot.lane.b32.xlu0 %v840_v30, %s867_s22  ;;  %v842_v31 = vpop.eup %841 }
 0x101   : > { %v844_v34 = vpop.eup %843 }
 0x102   : > { %v471_v35 = vadd.f32 1.0, %v844_v34  ;;  %v846_v36 = vpop.eup %845 }
 0x103   : > { %v580_v37 = vadd.f32 1.0, %v846_v36 }
 0x104   : > { %590 = vrot.lane.b32.xlu0 %v842_v31, %s867_s22  ;;  %847 = vrcp.f32 %v471_v35 }
 0x105   : > { %849 = vrcp.f32 %v580_v37 }
 0x10e   : > { %v848_v38 = vpop.eup %847 }
 0x10f   : > { %v850_v41 = vpop.eup %849  ;;  %v479_v45 = vmul.f32 %v848_v38, %v477_v44 }
 0x110   : > { %v588_v49 = vmul.f32 %v850_v41, %v586_v46 }
 0x172   : > { %v482_v39 = vpop.permute.xlu0 %481 }
 0x173   : > { %v484_v40 = vmul.f32 %v848_v38, %v482_v39 }
 0x175   : > { %486 = vrot.lane.b32.xlu0 %v484_v40, %s866_s20 }
 0x176   : > { %v591_v42 = vpop.permute.xlu0 %590 }
 0x177   : > { %v593_v43 = vmul.f32 %v850_v41, %v591_v42 }
 0x179   : > { %595 = vrot.lane.b32.xlu1 %v593_v43, %s866_s20 }
 0x1e7   : > { %v487_v47 = vpop.permute.xlu0 %486 }
 0x1e8   : > { %v489_v48 = vadd.f32 %v487_v47, %v479_v45 }
 0x1ea   : > { %851 = vtanh.f32 %v489_v48 }
 0x1eb   : > { %v596_v50 = vpop.permute.xlu1 %595 }
 0x1ec   : > { %v598_v51 = vadd.f32 %v596_v50, %v588_v49 }
 0x1ee   : > { %853 = vtanh.f32 %v598_v51 }
 0x1f4   : > { %v852_v52 = vpop.eup %851 }
 0x1f5   : > { %492 = vrot.lane.b32.xlu0 %v852_v52, %s867_s22 }
 0x1f8   : > { %v854_v53 = vpop.eup %853 }
 0x1f9   : > { %601 = vrot.lane.b32.xlu1 %v854_v53, %s867_s22 }
 0x1fd   : > { %612 = vrot.lane.b32.xlu1 %v489_v48, %s868_s17 }
 0x201   : > { %622 = vrot.lane.b32.xlu1 %v598_v51, %s868_s17 }
 0x267   : > { %v493_v54 = vpop.permute.xlu0 %492 }
 0x268   : > { %v495_v55 = vmul.f32 %v848_v38, %v493_v54 }
 0x26a   : > { %606 = vrot.lane.b32.xlu0 %v495_v55, %s866_s20 }
 0x26b   : > { %v602_v56 = vpop.permute.xlu1 %601 }
 0x26c   : > { %v604_v57 = vmul.f32 %v850_v41, %v602_v56 }
 0x26e   : > { %617 = vrot.lane.b32.xlu0 %v604_v57, %s866_s20 }
 0x26f   : > { %v613_v58 = vpop.permute.xlu1 %612 }
 0x270   : > { %615 = vst.msk [vmem:[#allocation3] sm:$0x3] %vm609_vm3, %v613_v58  ;;  %635 = vst.msk [vmem:[%s1038_s9] sm:$0x3] (!%p774_p6), %vm609_vm3, %v613_v58 }
 0x273   : > { %v623_v59 = vpop.permute.xlu1 %622 }
 0x274   : > { %625 = vst.msk [vmem:[#allocation5] sm:$0x3] %vm609_vm3, %v623_v59  ;;  %776 = vst.msk [vmem:[%s1038_s9 + $0x2] sm:$0x3] (!%p774_p6), %vm609_vm3, %v623_v59 }
 0x2db   : > { %631 = sbr.rel (%p774_p6) target bundleno = 739 (0x2e3), region = 52 }
 0x2dc   : > { %v607_v60 = vpop.permute.xlu0 %606 }
 0x2dd   : > { %610 = vst.msk [vmem:[#allocation2] sm:$0x3] %vm609_vm3, %v607_v60  ;;  %626 = vst.msk [vmem:[%s945_s24] sm:$0x3] %vm609_vm3, %v607_v60 }
 0x2de   : > { %632 = vst.msk [vmem:[%s1037_s8] sm:$0x3] (!%p774_p6), %vm609_vm3, %v607_v60 }
 0x2e0   : > { %v618_v61 = vpop.permute.xlu0 %617 }
 0x2e1   : > { %620 = vst.msk [vmem:[#allocation4] sm:$0x3] %vm609_vm3, %v618_v61  ;;  %627 = vst.msk [vmem:[%s950_s28] sm:$0x3] %vm609_vm3, %v618_v61 }
 0x2e2   : > { %775 = vst.msk [vmem:[%s1037_s8 + $0x2] sm:$0x3] %vm609_vm3, %v618_v61 }
 0x2e3 PF: > { %s20_s30 = sadd.s32 1, %s861_s30  }
 0x2e4   : > { %p17_p7 = scmp.ge.s32.totalorder %s20_s30, 10  }
 0x2e6   :  { %19 = sbr.rel (!%p17_p7) target bundleno = 1 (0x1), region = 117 }

</bundles_post_ra>
